<compile_context>
chip_gen: v7x
topology: tpu7x:2x2x1
jax: 0.10.0
libtpu: 0.0.40
codegen_flags: <defaults>
</compile_context>

<pallas_src>
import functools

import jax
import jax.numpy as jnp
from jax import lax
from jax.experimental import pallas as pl
from jax.experimental.pallas import tpu as pltpu


def _round_up(x, m):
    return (x + m - 1) // m * m


# ---------------------------------------------------------------------------
# Pallas kernel: out = relu?(patches @ W + bias), K collapsed (single dot).
#   patches (tm, Kp) bf16, W (Kp, tn) bf16, bias (1, tn) f32 -> out (tm, tn)
# ---------------------------------------------------------------------------
def _matmul_bias_act_kernel(p_ref, w_ref, b_ref, o_ref, *, apply_relu):
    res = jnp.dot(p_ref[...], w_ref[...],
                  preferred_element_type=jnp.float32) + b_ref[...]
    if apply_relu:
        res = jnp.maximum(res, 0.0)
    o_ref[...] = res.astype(o_ref.dtype)


def _pallas_matmul_bias_act(patches, w_pad, b_pad, n_valid, *, apply_relu,
                            out_dtype, tm_target=1024):
    """patches (M, Kp) bf16, w_pad (Kp, Cn) bf16, b_pad (1, Cn) f32.
    Returns (M, n_valid) in out_dtype."""
    Mtot, Kp = patches.shape
    Kp2, Cn = w_pad.shape
    assert Kp == Kp2 and Cn % 128 == 0 and b_pad.shape == (1, Cn)

    tn = 256 if Cn % 256 == 0 else 128
    tm = min(tm_target, _round_up(Mtot, 16))
    # v7x has 2 TensorCores: ensure a parallel axis has >= 2 steps when possible.
    if (Cn // tn) < 2 and Mtot > 16:
        tm = min(tm, _round_up((Mtot + 1) // 2, 16))
    Mp = _round_up(Mtot, tm)

    p = patches.astype(jnp.bfloat16)
    if Mp != Mtot:
        p = jnp.pad(p, ((0, Mp - Mtot), (0, 0)))

    out_bytes = jnp.dtype(out_dtype).itemsize
    kernel = functools.partial(_matmul_bias_act_kernel, apply_relu=apply_relu)

    out = pl.pallas_call(
        kernel,
        out_shape=jax.ShapeDtypeStruct((Mp, Cn), out_dtype),
        grid_spec=pltpu.PrefetchScalarGridSpec(
            num_scalar_prefetch=0,
            grid=(Mp // tm, Cn // tn),
            in_specs=[
                pl.BlockSpec((tm, Kp), lambda i, j: (i, 0)),
                pl.BlockSpec((Kp, tn), lambda i, j: (0, j)),
                pl.BlockSpec((1, tn), lambda i, j: (0, j)),
            ],
            out_specs=pl.BlockSpec((tm, tn), lambda i, j: (i, j)),
        ),
        compiler_params=pltpu.CompilerParams(
            dimension_semantics=("parallel", "parallel"),
            vmem_limit_bytes=40 * 1024 * 1024,
        ),
        cost_estimate=pl.CostEstimate(
            flops=int(2 * Mp * Kp * Cn),
            transcendentals=0,
            bytes_accessed=int(Mp * Kp * 2 + Kp * Cn * 2
                               + Mp * Cn * out_bytes + Cn * 4),
        ),
    )(p, w_pad, b_pad)
    return out[:Mtot, :n_valid]


# ---------------------------------------------------------------------------
# XLA glue: im2col (pure slicing) and prep-time weight construction
# ---------------------------------------------------------------------------
def _im2col(x_nhwc, kh, kw, pad_k_to=None):
    """(B, Hp, Wp, Cin) -> (B*Ho*Wo, K[, zero-padded]), K ordered (dy, dx, cin)."""
    B, Hp, Wp, Cin = x_nhwc.shape
    Ho, Wo = Hp - kh + 1, Wp - kw + 1
    cols = [x_nhwc[:, dy:dy + Ho, dx:dx + Wo, :]
            for dy in range(kh) for dx in range(kw)]
    K = kh * kw * Cin
    if pad_k_to is not None and pad_k_to > K:
        cols.append(jnp.zeros((B, Ho, Wo, pad_k_to - K), x_nhwc.dtype))
        K = pad_k_to
    patches = jnp.concatenate(cols, axis=-1)
    return patches.reshape(B * Ho * Wo, K), Ho, Wo


def _flipped_weight(w_pt):
    """PyTorch ConvTranspose2d weight (Cin, Cout, kh, kw) -> correlation weight
    (kh, kw, Cin, Cout), spatially flipped."""
    return jnp.flip(jnp.transpose(w_pt, (2, 3, 0, 1)), axis=(0, 1))


def _fused_phase_weight_s2_k5(w_pt):
    """Fused 4-phase weight for ConvTranspose2d(k=5, s=2, p=2, op=1).

    With wf = flipped kernel and output index o = 2m + q (q in {0,1}):
      O[2m]   = wf[0]*x[m-1] + wf[2]*x[m] + wf[4]*x[m+1]
      O[2m+1] =                wf[1]*x[m] + wf[3]*x[m+1]
    Both phases read the same 3-tap window x[m-1..m+1] (input padded (1,1));
    phase q uses tap wf[2*j - q] at window position j (out-of-range => zero).
    Returns (9*Cin, 4*Cout): K ordered (jy, jx, cin), N ordered (qy, qx, cout).
    """
    Cin, Cout, kh, kw = w_pt.shape
    assert (kh, kw) == (5, 5)
    wf = _flipped_weight(w_pt)                      # (5, 5, Cin, Cout)

    def tap(q, j):
        t = 2 * j - q
        return t if 0 <= t < 5 else None

    phase_cols = []
    for qy in (0, 1):
        for qx in (0, 1):
            rows = []
            for jy in range(3):
                for jx in range(3):
                    ty, tx = tap(qy, jy), tap(qx, jx)
                    if ty is None or tx is None:
                        rows.append(jnp.zeros((Cin, Cout), wf.dtype))
                    else:
                        rows.append(wf[ty, tx])
            phase_cols.append(jnp.concatenate(rows, axis=0))    # (9*Cin, Cout)
    return jnp.concatenate(phase_cols, axis=1)                  # (9*Cin, 4*Cout)


def _pad_weight_bias(wmat, bias):
    """(K, Cout) f32, (Cout,) -> bf16 (Kp, Cn), f32 (1, Cn); Kp/Cn 128-aligned."""
    K, Cout = wmat.shape
    Kp, Cn = _round_up(K, 128), _round_up(Cout, 128)
    w = jnp.pad(wmat, ((0, Kp - K), (0, Cn - Cout))).astype(jnp.bfloat16)
    b = jnp.pad(bias.astype(jnp.float32), (0, Cn - Cout)).reshape(1, Cn)
    return w, b


def prepare_params(params):
    """One-time prep: fused/flipped, lane-dense bf16 weight matrices + f32 biases."""
    prep = {}
    for i in (1, 2):
        wf = _fused_phase_weight_s2_k5(params[f"w{i}"])          # (9*Cin, 4*Cout)
        bf = jnp.tile(params[f"b{i}"].astype(jnp.float32), 4)    # (4*Cout,)
        prep[f"w{i}"], prep[f"b{i}"] = _pad_weight_bias(wf, bf)
    Cin3, Cout3 = params["w3"].shape[0], params["w3"].shape[1]
    w3 = _flipped_weight(params["w3"]).reshape(9 * Cin3, Cout3)
    prep["w3"], prep["b3"] = _pad_weight_bias(w3, params["b3"])
    return prep


# ---------------------------------------------------------------------------
# Conv wrappers
# ---------------------------------------------------------------------------
def conv_transpose2d_s2_fused(x_nhwc, w_pad, b_pad, cout, *, apply_relu, out_dtype):
    """ConvTranspose2d(k=5, s=2, p=2, op=1) as one fused 4-phase GEMM."""
    B, H, W, _ = x_nhwc.shape
    xp = jnp.pad(x_nhwc.astype(jnp.bfloat16), ((0, 0), (1, 1), (1, 1), (0, 0)))
    patches, Ho, Wo = _im2col(xp, 3, 3, pad_k_to=w_pad.shape[0])  # Ho=H, Wo=W
    out = _pallas_matmul_bias_act(patches, w_pad, b_pad, 4 * cout,
                                  apply_relu=apply_relu, out_dtype=out_dtype)
    out = out.reshape(B, Ho, Wo, 2, 2, cout)        # (..., qy, qx, c)
    out = jnp.transpose(out, (0, 1, 3, 2, 4, 5))    # (B, H, qy, W, qx, c)
    return out.reshape(B, 2 * Ho, 2 * Wo, cout)     # O[2m+qy, 2n+qx]


def conv_transpose2d_s1_k3_p1(x_nhwc, w_pad, b_pad, cout, *, apply_relu, out_dtype):
    """Stride-1 ConvTranspose2d(k=3, p=1) == correlation with flipped kernel, pad 1."""
    B, H, W, _ = x_nhwc.shape
    xp = jnp.pad(x_nhwc.astype(jnp.bfloat16), ((0, 0), (1, 1), (1, 1), (0, 0)))
    patches, Ho, Wo = _im2col(xp, 3, 3, pad_k_to=w_pad.shape[0])
    out = _pallas_matmul_bias_act(patches, w_pad, b_pad, cout,
                                  apply_relu=apply_relu, out_dtype=out_dtype)
    return out.reshape(B, Ho, Wo, cout)


# ---------------------------------------------------------------------------
# HyperpriorSynthesis forward (activation='relu', final_activation=None)
# ---------------------------------------------------------------------------
def hyperprior_synthesis(x_nchw, prep, couts):
    c1, c2, c3 = couts
    x = jnp.transpose(x_nchw, (0, 2, 3, 1))                      # NCHW -> NHWC
    x = conv_transpose2d_s2_fused(x, prep["w1"], prep["b1"], c1,
                                  apply_relu=True, out_dtype=jnp.bfloat16)
    x = conv_transpose2d_s2_fused(x, prep["w2"], prep["b2"], c2,
                                  apply_relu=True, out_dtype=jnp.bfloat16)
    x = conv_transpose2d_s1_k3_p1(x, prep["w3"], prep["b3"], c3,
                                  apply_relu=False, out_dtype=jnp.float32)
    # TODO(synk): final_activation is None in the default config, so no-op here.
    return jnp.transpose(x, (0, 3, 1, 2))                        # NHWC -> NCHW


def init_params(key, N, C):
    ks = jax.random.split(key, 6)

    def w(k, cin, cout, ksz):
        return jax.random.normal(k, (cin, cout, ksz, ksz), jnp.float32) * 0.05

    return {
        "w1": w(ks[0], N, N, 5), "b1": jax.random.normal(ks[1], (N,), jnp.float32) * 0.01,
        "w2": w(ks[2], N, N, 5), "b2": jax.random.normal(ks[3], (N,), jnp.float32) * 0.01,
        "w3": w(ks[4], N, C, 3), "b3": jax.random.normal(ks[5], (C,), jnp.float32) * 0.01,
    }


# ---------------------------------------------------------------------------
# Pure-XLA reference (dilated-conv formulation; same bf16 operand casting)
# ---------------------------------------------------------------------------
def _ref_conv_transpose(x_nhwc, w_pt, b, stride, padding, output_padding):
    Cin, Cout, kh, kw = w_pt.shape
    w_eq = _flipped_weight(w_pt).astype(jnp.bfloat16)            # HWIO
    lo, hi = kh - 1 - padding, kh - 1 - padding + output_padding
    out = lax.conv_general_dilated(
        x_nhwc.astype(jnp.bfloat16), w_eq, window_strides=(1, 1),
        padding=((lo, hi), (lo, hi)),
        lhs_dilation=(stride, stride),
        dimension_numbers=("NHWC", "HWIO", "NHWC"),
        preferred_element_type=jnp.float32)
    return out + b


def _ref_forward(x_nchw, params):
    x = jnp.transpose(x_nchw, (0, 2, 3, 1))
    x = jax.nn.relu(_ref_conv_transpose(x, params["w1"], params["b1"], 2, 2, 1))
    x = jax.nn.relu(_ref_conv_transpose(x, params["w2"], params["b2"], 2, 2, 1))
    x = _ref_conv_transpose(x, params["w3"], params["b3"], 1, 1, 0)
    return jnp.transpose(x, (0, 3, 1, 2))


if __name__ == "__main__":
    # Small, module-consistent shapes: N=16 hyper-latent channels, C=12 output
    # channels, batch=2, 8x8 hyper-latent grid -> 32x32 output.
    N, C = 16, 12
    B, H, W = 2, 8, 8

    key = jax.random.PRNGKey(0)
    kx, kp, k1, k2, k3 = jax.random.split(key, 5)

    # (1) Direct check of the K-collapsed GEMM kernel: M padding + >=2 M grid
    #     steps, lane-padded N, prep-time K padding.
    a = jax.random.normal(k1, (70, 144), jnp.float32)
    wt = jax.random.normal(k2, (144, 200), jnp.float32) * 0.05
    bb = jax.random.normal(k3, (200,), jnp.float32) * 0.01
    w_pad, b_pad = _pad_weight_bias(wt, bb)
    a_p = jnp.pad(a.astype(jnp.bfloat16), ((0, 0), (0, w_pad.shape[0] - 144)))
    got = jax.block_until_ready(
        _pallas_matmul_bias_act(a_p, w_pad, b_pad, 200,
                                apply_relu=True, out_dtype=jnp.float32))
    want = jnp.maximum(
        jnp.dot(a.astype(jnp.bfloat16).astype(jnp.float32),
                wt.astype(jnp.bfloat16).astype(jnp.float32)) + bb, 0.0)
    assert bool(jnp.allclose(got, want, atol=1e-2, rtol=1e-2)), \
        float(jnp.max(jnp.abs(got - want)))

    # (2) Full forward vs XLA reference.
    x = jax.random.normal(kx, (B, N, H, W), jnp.float32)
    params = init_params(kp, N, C)
    prep = prepare_params(params)                   # one-time weight prep

    fwd = jax.jit(functools.partial(hyperprior_synthesis, couts=(N, N, C)))
    out = jax.block_until_ready(fwd(x, prep))
    assert out.shape == (B, C, 4 * H, 4 * W), out.shape

    ref = jax.block_until_ready(jax.jit(_ref_forward)(x, params))
    max_err = float(jnp.max(jnp.abs(out - ref)))
    assert bool(jnp.allclose(out, ref, atol=3e-3, rtol=3e-3)), max_err

    print("KERNEL_OK")
</pallas_src>

<mosaic_0001>
module attributes {stable_mosaic.version = 11 : i64} {
  func.func @_matmul_bias_act_kernel(%arg0: i32, %arg1: i32, %arg2: memref<48x256xbf16, #tpu.memory_space<vmem>>, %arg3: memref<256x256xbf16, #tpu.memory_space<vmem>>, %arg4: memref<1x256xf32, #tpu.memory_space<vmem>>, %arg5: memref<48x256xf32, #tpu.memory_space<vmem>>) attributes {dimension_semantics = [#tpu.dimension_semantics<parallel>, #tpu.dimension_semantics<parallel>], iteration_bounds = array<i64: 2, 1>, scalar_prefetch = 0 : i64, scratch_operands = 0 : i64, tpu.core_type = #tpu.core_type<tc>, window_params = [{transform_indices = @transform_0, window_bounds = array<i64: 48, 256>}, {transform_indices = @transform_1, window_bounds = array<i64: 256, 256>}, {transform_indices = @transform_2, window_bounds = array<i64: 1, 256>}, {transform_indices = @transform_3, window_bounds = array<i64: 48, 256>}]} {
    %c0 = arith.constant 0 : index
    %c0_0 = arith.constant 0 : index
    %0 = vector.load %arg2[%c0, %c0_0] : memref<48x256xbf16, #tpu.memory_space<vmem>>, vector<48x256xbf16>
    %c0_1 = arith.constant 0 : index
    %c0_2 = arith.constant 0 : index
    %1 = vector.load %arg3[%c0_1, %c0_2] : memref<256x256xbf16, #tpu.memory_space<vmem>>, vector<256x256xbf16>
    %cst = arith.constant dense<0.000000e+00> : vector<48x256xf32>
    %2 = tpu.matmul %0, %1, %cst {dimension_numbers = #tpu.dot_dimension_numbers<[1], [0], [0], [1], [0, 0, 1, 1], [], []>} : vector<48x256xbf16>, vector<256x256xbf16>, vector<48x256xf32> -> vector<48x256xf32>
    %c0_3 = arith.constant 0 : index
    %c0_4 = arith.constant 0 : index
    %3 = vector.load %arg4[%c0_3, %c0_4] : memref<1x256xf32, #tpu.memory_space<vmem>>, vector<1x256xf32>
    %4 = vector.broadcast %3 : vector<1x256xf32> to vector<48x256xf32>
    %5 = arith.addf %2, %4 : vector<48x256xf32>
    %cst_5 = arith.constant 0.000000e+00 : f32
    %6 = vector.broadcast %cst_5 : f32 to vector<48x256xf32>
    %7 = arith.maximumf %5, %6 : vector<48x256xf32>
    %c0_6 = arith.constant 0 : index
    %c0_7 = arith.constant 0 : index
    %8 = vector.load %arg5[%c0_6, %c0_7] : memref<48x256xf32, #tpu.memory_space<vmem>>, vector<48x256xf32>
    tpu.vector_store %arg5[%c0_6, %c0_7], %7 {strides = array<i32>} : memref<48x256xf32, #tpu.memory_space<vmem>>, vector<48x256xf32>,
    return
  }
  func.func @transform_0(%arg0: i32, %arg1: i32) -> (i32, i32) {
    %c0_i32 = arith.constant 0 : i32
    %c0_i32_0 = arith.constant 0 : i32
    return %arg0, %c0_i32 : i32, i32
  }
  func.func @transform_1(%arg0: i32, %arg1: i32) -> (i32, i32) {
    %c0_i32 = arith.constant 0 : i32
    %c0_i32_0 = arith.constant 0 : i32
    return %c0_i32, %arg1 : i32, i32
  }
  func.func @transform_2(%arg0: i32, %arg1: i32) -> (i32, i32) {
    %c0_i32 = arith.constant 0 : i32
    %c0_i32_0 = arith.constant 0 : i32
    return %c0_i32, %arg1 : i32, i32
  }
  func.func @transform_3(%arg0: i32, %arg1: i32) -> (i32, i32) {
    %c0_i32 = arith.constant 0 : i32
    return %arg0, %arg1 : i32, i32
  }
}

</mosaic_0001>

<bundles_post_ra>
// kernel: tpu_custom_call.1
= control target key start
LH: loop header
LB: loop body
LE: loop exit
PB: predicated region body
PF: predicated region fallthrough
CT: control target
= control target key end

     0   :  { %8 = vsyncpa [#allocation3], 0  ;;  %s1348_s0 = inlined_call_operand.hbm [shape: bf16[96,256], index: 0, kind: input, shape index: {}]   ;;  %s1349_s1 = inlined_call_operand.hbm [shape: bf16[256,256], index: 1, kind: input, shape index: {}]   ;;  %s1350_s2 = inlined_call_operand.vmem [shape: f32[1,256], index: 2, kind: input, shape index: {}]   ;;  %s1351_s3 = inlined_call_operand.hbm [shape: f32[96,256], index: 3, kind: output, shape index: {}]  }
   0x1   :  { %10 = vsyncpa [#allocation3 + $0x1], 0 }
   0x2   :  { %11 = vsyncpa [#allocation6], 0 }
   0x3   :  { %12 = vsyncpa [#allocation4], 0 }
   0x4   :  { %14 = vsyncpa [#allocation4 + $0x1], 0  ;;  %s1102_s12 = smov 0   ;;  %s1104_s13 = smov 0  }
   0x5   :  { %s1106_s14 = smov 0   ;;  %s1108_s15 = smov 0  }
   0x6   :  { %s1110_s16 = smov 0   ;;  %s1112_s17 = smov 0  }
   0x7 LB: > { %s702_s18 = sadd.s32 4294967295, %s1073_s17   ;;  %s703_s19 = sadd.s32 4294967294, %s1073_s17   ;;  %s1073_s17 = sphi %s1112_s17, %s20_s17   ;;  %s1069_s16 = sphi %s1110_s16, %s1374_s16   ;;  %s1065_s15 = sphi %s1108_s15, %s1373_s15   ;;  %s1061_s14 = sphi %s1106_s14, %s1372_s14   ;;  %s1057_s13 = sphi %s1104_s13, %s1371_s13   ;;  %s1053_s12 = sphi %s1102_s12, %s1370_s12  }
   0x8   : > { %p52_p0 = scmp.ne.s32.totalorder %s1057_s13, %s1053_s12  ;;  %p1136_p1 = scmp.eq.s32.totalorder %s702_s18, 0 }
   0x9   : > { %p1140_p2 = scmp.eq.s32.totalorder %s702_s18, 1  ;;  %p136_p3 = scmp.eq.s32.totalorder %s703_s19, 1 }
   0xa   : > { %s1356_s20 = scalar_select %p1136_p1, 1, 0 }
   0xb   : > { %s1357_s21 = scalar_select %p1140_p2, 1, 0 }
   0xc   : > { %p1146_p4 = por %p1136_p1, %p52_p0  ;;  %p704_p5 = scmp.ge.s32.totalorder %s1073_s17, 1 }
   0xd   : > { %p1151_p6 = por %p136_p3, %p52_p0  ;;  %p143_p7 = scmp.lt.s32.totalorder %s1073_s17, 3 }
   0xe   : > { %s1358_s22 = scalar_select %p1146_p4, 1, 0 }
   0xf   : > { %s1359_s23 = scalar_select %p1151_p6, 1, 0 }
  0x10   : > { %p1156_p8 = pnand %p704_p5, %p143_p7  ;;  %s1075_s25 = smov [#allocation5]  }
  0x11   : > { %s158_s26 = sshll.u32 %s1075_s25, 4  ;;  %s32_s28 = sadd.s32 1, %s1069_s16  ;;  %s159_s26 = int_to_ptr.vmem [resolvable:$true] %s158_s26 }
  0x12   : > { %s1360_s24 = scalar_select %p1156_p8, 1, 0 }
  0x13   : > { %p803_p9 = pneg %p1156_p8  ;;  %s929_s4 = scalar_lea.hbm %s1349_s1, 4096 }
  0x14   : > { %p930_p12 = scmp.ne.s32.totalorder %s1349_s1, %s929_s4  ;;  %p936_p5 = scmp.lt.u32.totalorder %s929_s4, %s1349_s1 }
  0x15   : > { %p1165_p11 = pnand %p803_p9, %p1136_p1 }
  0x17   : > { %p931_p13 = pneg %p1165_p11 }
  0x19   : > { %p932_p0 = pnand %p931_p13, %p930_p12 }
  0x1b   : > { %p933_p3 = pneg %p932_p0 }
  0x1d   : > { %p938_p7 = pnand %p936_p5, %p933_p3 }
  0x1f   : > { %941 = shalt.err (!%p938_p7)
}
  0x20   : > { %s942_s9 = scalar_lea.vmem %s159_s26, 4096  ;;  %p950_p1 = scmp.lt.s32.totalorder %s159_s26, %s159_s26 }
  0x21   : > { %p943_p9 = scmp.ne.s32.totalorder %s159_s26, %s942_s9  ;;  %p951_p4 = scmp.lt.s32.totalorder %s942_s9, %s942_s9 }
  0x23   : > { %p945_p10 = pnand %p943_p9, %p931_p13  ;;  %p952_p8 = por %p951_p4, %p950_p1 }
  0x25   : > { %p946_p6 = pneg %p945_p10 }
  0x27   : > { %p953_p2 = pnand %p952_p8, %p946_p6 }
  0x29   : > { %956 = shalt.err (!%p953_p2)
}
  0x2a   : > { %s1076_s10 = smov 128   ;;  %s1077_s11 = smov 8  }
  0x2b   : > { %806 = dma.hbm_to_vmem [thread:$0]  (!%p1165_p11), %s1349_s1, 4096, %s159_s26, [#allocation6], %s1076_s10, %s1076_s10, %s1077_s11  }
  0x2c   : > { %p34_p1 = scmp.ge.s32.totalorder %s32_s28, 2  ;;  %s39_s25 = sadd.s32 1, %s1061_s14 }
  0x2d   : > { %p46_p2 = scmp.ne.s32.totalorder %s1061_s14, %s1057_s13  ;;  %p47_p4 = scmp.eq.s32.totalorder %s1073_s17, 0 }
  0x2e   : > { %s1376_s28 = smov (%p34_p1, %s32_s28), 0  ;;  %p1362_p8 = scmp.ne.s32.totalorder %s1357_s21, 0 }
  0x2f   : > { %p48_p6 = por %p47_p4, %p46_p2  ;;  %s36_s27 = ssub.s32 %s1069_s16, %s1376_s28 }
  0x30   : > { %p1197_p10 = por %p1362_p8, %p46_p2  ;;  %p816_p12 = scmp.lt.s32.totalorder %s1073_s17, 2 }
  0x31   : > { %p37_p13 = scmp.eq.s32.totalorder %s36_s27, 0  ;;  %s180_s30 = sand.u32 1, %s1061_s14  }
  0x32   : > { %s792_s4 = smul.u32 48, %s180_s30  ;;  %p1209_p11 = pnand %p816_p12, %p48_p6 }
  0x33   : > { %s1206_s5 = scalar_select %p37_p13, %s1061_s14, %s39_s25  }
  0x34   : > { %s758_s26 = smul.u32 768, %s1069_s16  ;;  %s184_s6 = scalar_lea.vmem [#allocation2], %s792_s4 }
  0x35   : > { %s192_s7 = sshll.u32 %s184_s6, 4  ;;  %s1220_s19 = scalar_lea.sflag [#allocation3], %s180_s30  ;;  %s1218_s7 = int_to_ptr.vmem [resolvable:$true] %s192_s7 }
  0x36   : > { %s1216_s18 = scalar_lea.hbm %s1348_s0, %s758_s26  ;;  %p959_p3 = pneg %p1209_p11 }
  0x37   : > { %s957_s25 = scalar_lea.hbm %s1216_s18, 768  ;;  %s962_s26 = scalar_lea.hbm %s1348_s0, 1536 }
  0x38   : > { %p958_p0 = scmp.ne.s32.totalorder %s1216_s18, %s957_s25  ;;  %p963_p9 = scmp.lt.u32.totalorder %s1216_s18, %s1348_s0 }
  0x39   : > { %p964_p1 = scmp.lt.u32.totalorder %s962_s26, %s957_s25  ;;  %p966_p4 = scmp.lt.u32.totalorder %s957_s25, %s1216_s18 }
  0x3a   : > { %p960_p5 = pnand %p959_p3, %p958_p0 }
  0x3b   : > { %p965_p2 = por %p964_p1, %p963_p9 }
  0x3c   : > { %p961_p7 = pneg %p960_p5 }
  0x3d   : > { %p967_p6 = por %p966_p4, %p965_p2 }
  0x3f   : > { %p968_p8 = pnand %p967_p6, %p961_p7 }
  0x41   : > { %971 = shalt.err (!%p968_p8)
}
  0x42   : > { %s972_s30 = scalar_lea.vmem %s1218_s7, 768  ;;  %s1078_s21 = smov [#allocation2]  }
  0x43   : > { %p973_p12 = scmp.ne.s32.totalorder %s1218_s7, %s972_s30  ;;  %s977_s27 = sshll.u32 %s1078_s21, 4  ;;  %s978_s27 = int_to_ptr.vmem [resolvable:$false] %s977_s27 }
  0x44   : > { %s979_s4 = scalar_lea.vmem %s978_s27, 1536  ;;  %p980_p5 = scmp.lt.s32.totalorder %s1218_s7, %s978_s27 }
  0x45   : > { %p975_p13 = pnand %p973_p12, %p959_p3  ;;  %p981_p9 = scmp.lt.s32.totalorder %s979_s4, %s972_s30 }
  0x47   : > { %p976_p0 = pneg %p975_p13  ;;  %p982_p1 = por %p981_p9, %p980_p5 }
  0x49   : > { %p983_p2 = pnand %p982_p1, %p976_p0 }
  0x4b   : > { %986 = shalt.err (!%p983_p2)
}
  0x4c   : > { %810 = dma.hbm_to_vmem [thread:$0]  (!%p1209_p11), %s1216_s18, 768, %s1218_s7, %s1220_s19, %s1076_s10, %s1076_s10, %s1077_s11  }
  0x4d   : > { %p1365_p3 = scmp.ne.s32.totalorder %s1360_s24, 0 }
  0x4e   : > { %s1254_s25 = sand.u32 (!%p1365_p3), 1, %s1057_s13   ;;  %p1366_p7 = scmp.ne.s32.totalorder (!%p1365_p3), %s1358_s22, 0 }
  0x4f   : > { %204 = sbr.rel (%p1365_p3) target bundleno = 397 (0x18d), region = 32  ;;  %s207_s6 = scalar_lea.sflag (!%p1365_p3), [#allocation3], %s1254_s25 }
  0x50   : > { %s793_s26 = smul.u32 (!%p1365_p3), 48, %s1254_s25 }
  0x52   : > { %s1258_s9 = scalar_lea.vmem (!%p1365_p3), [#allocation2], %s793_s26 }
  0x56   : > { %1040 = dma.done.wait (%p1366_p7), %s207_s6, 768  }
  0x57   : > { %1042 = vsyncadd (%p1366_p7), %s207_s6, 4294966528  ;;  %p1367_p11 = scmp.ne.s32.totalorder %s1356_s20, 0 }
  0x59   : > { %1044 = dma.done.wait (%p1367_p11), [#allocation6], 4096  }
  0x5a   : > { %1046 = vsyncadd (%p1367_p11), [#allocation6], 4294963200  ;;  %v872_v0 = vld [vmem:[#allocation5 + $0x4] ss:$8 sps:$4 sm:$0xff]   ;;  %v874_v1 = vld [vmem:[#allocation5] ss:$8 sps:$4 sm:$0xff]   ;;  %v290_v38 = vlaneseq }
  0x5b   : > { %760 = vmatprep.subr.bf16.mxu1 %v872_v0  ;;  %v875_v2 = vld [vmem:[#allocation5 + $0x14] ss:$8 sps:$4 sm:$0xff]   ;;  %490 = vmatprep.subr.bf16.mxu0 %v872_v0  ;;  %v877_v3 = vld [vmem:[#allocation5 + $0x10] ss:$8 sps:$4 sm:$0xff]   ;;  %v878_v4 = vld [vmem:[#allocation5 + $0x24] ss:$8 sps:$4 sm:$0xff]  }
  0x5c   : > { %776 = vmatpush1.bf16.msra.mxu1 %v874_v1  ;;  %491 = vmatpush1.bf16.msra.mxu0 %v874_v1  ;;  %v880_v5 = vld [vmem:[#allocation5 + $0x20] ss:$8 sps:$4 sm:$0xff]   ;;  %v881_v6 = vld [vmem:[#allocation5 + $0x34] ss:$8 sps:$4 sm:$0xff]   ;;  %v883_v7 = vld [vmem:[#allocation5 + $0x30] ss:$8 sps:$4 sm:$0xff]  }
  0x5d   : > { %761 = vmatprep.subr.bf16.mxu1 %v875_v2  ;;  %492 = vmatprep.subr.bf16.mxu0 %v875_v2  ;;  %v884_v8 = vld [vmem:[#allocation5 + $0x44] ss:$8 sps:$4 sm:$0xff]   ;;  %v886_v9 = vld [vmem:[#allocation5 + $0x40] ss:$8 sps:$4 sm:$0xff]   ;;  %v887_v10 = vld [vmem:[#allocation5 + $0x54] ss:$8 sps:$4 sm:$0xff]  }
  0x5e   : > { %v889_v11 = vld [vmem:[#allocation5 + $0x50] ss:$8 sps:$4 sm:$0xff]   ;;  %v890_v12 = vld [vmem:[#allocation5 + $0x64] ss:$8 sps:$4 sm:$0xff]   ;;  %v892_v14 = vld [vmem:[#allocation5 + $0x60] ss:$8 sps:$4 sm:$0xff]  }
  0x5f   : > { %v922_v13 = vld [vmem:[%s1258_s9 + $0x14] ss:$8 sps:$4 sm:$0xff]   ;;  %v925_v15 = vld [vmem:[%s1258_s9 + $0x4] ss:$8 sps:$4 sm:$0xff]   ;;  %v895_v17 = vld [vmem:[#allocation5 + $0x70] ss:$8 sps:$4 sm:$0xff]  }
  0x60   : > { %777 = vmatpush1.bf16.msra.mxu1 %v877_v3  ;;  %493 = vmatpush1.bf16.msra.mxu0 %v877_v3  ;;  %v893_v16 = vld [vmem:[#allocation5 + $0x74] ss:$8 sps:$4 sm:$0xff]   ;;  %v896_v18 = vld [vmem:[#allocation5 + $0x84] ss:$8 sps:$4 sm:$0xff]   ;;  %v898_v19 = vld [vmem:[#allocation5 + $0x80] ss:$8 sps:$4 sm:$0xff]  }
  0x61   : > { %762 = vmatprep.subr.bf16.mxu1 %v878_v4  ;;  %494 = vmatprep.subr.bf16.mxu0 %v878_v4  ;;  %v899_v20 = vld [vmem:[#allocation5 + $0x94] ss:$8 sps:$4 sm:$0xff]   ;;  %v901_v21 = vld [vmem:[#allocation5 + $0x90] ss:$8 sps:$4 sm:$0xff]   ;;  %v902_v22 = vld [vmem:[#allocation5 + $0xa4] ss:$8 sps:$4 sm:$0xff]  }
  0x62   : > { %532 = vmatprep.mubr.bf16.mxu1 %v922_v13  ;;  %522 = vmatprep.mubr.bf16.mxu0 %v925_v15  ;;  %v904_v23 = vld [vmem:[#allocation5 + $0xa0] ss:$8 sps:$4 sm:$0xff]   ;;  %v905_v24 = vld [vmem:[#allocation5 + $0xb4] ss:$8 sps:$4 sm:$0xff]   ;;  %v907_v25 = vld [vmem:[#allocation5 + $0xb0] ss:$8 sps:$4 sm:$0xff]  }
  0x63   : > { %v908_v26 = vld [vmem:[#allocation5 + $0xc4] ss:$8 sps:$4 sm:$0xff]   ;;  %v910_v27 = vld [vmem:[#allocation5 + $0xc0] ss:$8 sps:$4 sm:$0xff]   ;;  %v911_v28 = vld [vmem:[#allocation5 + $0xd4] ss:$8 sps:$4 sm:$0xff]  }
  0x64   : > { %778 = vmatpush1.bf16.msra.mxu1 %v880_v5  ;;  %495 = vmatpush1.bf16.msra.mxu0 %v880_v5  ;;  %v913_v29 = vld [vmem:[#allocation5 + $0xd0] ss:$8 sps:$4 sm:$0xff]   ;;  %v914_v30 = vld [vmem:[#allocation5 + $0xe4] ss:$8 sps:$4 sm:$0xff]   ;;  %v916_v31 = vld [vmem:[#allocation5 + $0xe0] ss:$8 sps:$4 sm:$0xff]  }
  0x65   : > { %763 = vmatprep.subr.bf16.mxu1 %v881_v6  ;;  %496 = vmatprep.subr.bf16.mxu0 %v881_v6  ;;  %v917_v32 = vld [vmem:[#allocation5 + $0xf4] ss:$8 sps:$4 sm:$0xff]   ;;  %v919_v33 = vld [vmem:[#allocation5 + $0xf0] ss:$8 sps:$4 sm:$0xff]   ;;  %v291_v39 = vshrl.u32 %v290_v38, 7  ;;  %s794_s24 = smul.u32 96, %s1254_s25 }
  0x66   : > { %v920_v34 = vld [vmem:[%s1258_s9 + $0x10] ss:$8 sps:$4 sm:$0xff]   ;;  %v923_v35 = vld [vmem:[%s1258_s9] ss:$8 sps:$4 sm:$0xff]   ;;  %v926_v36 = vld [vmem:[%s1258_s9 + $0x24] ss:$8 sps:$4 sm:$0xff]  }
  0x67   : > { %v928_v37 = vld [vmem:[%s1258_s9 + $0x20] ss:$8 sps:$4 sm:$0xff]   ;;  %v292_v40 = vsub.s32 0, %v291_v39  ;;  %v296_v42 = vsub.s32 1, %v291_v39  ;;  %s1278_s10 = scalar_lea.vmem [#allocation7], %s794_s24  ;;  %s759_s11 = smul.u32 1536, %s1065_s15 }
  0x68   : > { %779 = vmatpush1.bf16.msra.mxu1 %v883_v7  ;;  %497 = vmatpush1.bf16.msra.mxu0 %v883_v7  ;;  %v288_v41 = vld [vmem:[%s1350_s2] sm:$0x3]  ;;  %s594_s7 = sshll.u32 %s1278_s10, 4  ;;  %s578_s15 = scalar_lea.sflag [#allocation4], %s1254_s25  ;;  %s1296_s7 = int_to_ptr.vmem [resolvable:$true] %s594_s7 }
  0x69   : > { %764 = vmatprep.subr.bf16.mxu1 %v884_v8  ;;  %498 = vmatprep.subr.bf16.mxu0 %v884_v8  ;;  %v293_v43 = vrot.slane %v288_v41, %v292_v40  ;;  %v297_v44 = vrot.slane %v288_v41, %v296_v42  ;;  %s1294_s19 = scalar_lea.hbm %s1351_s3, %s759_s11  ;;  %s987_s30 = scalar_lea.vmem %s1296_s7, 1536 }
  0x6a   : > { %p988_p4 = scmp.ne.s32.totalorder %s1296_s7, %s987_s30  ;;  %s1079_s21 = smov [#allocation7]  }
  0x6b   : > { %s991_s27 = sshll.u32 %s1079_s21, 4  ;;  %s992_s27 = int_to_ptr.vmem [resolvable:$false] %s991_s27 }
  0x6c   : > { %780 = vmatpush1.bf16.msra.mxu1 %v886_v9  ;;  %499 = vmatpush1.bf16.msra.mxu0 %v886_v9  ;;  %p989_p6 = pnand %p988_p4, %p1197_p10  ;;  %s993_s4 = scalar_lea.vmem %s992_s27, 3072 }
  0x6d   : > { %765 = vmatprep.subr.bf16.mxu1 %v887_v10  ;;  %500 = vmatprep.subr.bf16.mxu0 %v887_v10  ;;  %p994_p12 = scmp.lt.s32.totalorder %s1296_s7, %s992_s27  ;;  %p995_p13 = scmp.lt.s32.totalorder %s993_s4, %s987_s30 }
  0x6e   : > { %p990_p8 = pneg %p989_p6 }
  0x6f   : > { %p996_p0 = por %p995_p13, %p994_p12 }
  0x70   : > { %781 = vmatpush1.bf16.msra.mxu1 %v889_v11  ;;  %501 = vmatpush1.bf16.msra.mxu0 %v889_v11 }
  0x71   : > { %766 = vmatprep.subr.bf16.mxu1 %v890_v12  ;;  %502 = vmatprep.subr.bf16.mxu0 %v890_v12  ;;  %p997_p5 = pnand %p996_p0, %p990_p8 }
  0x74   : > { %782 = vmatpush1.bf16.msra.mxu1 %v892_v14  ;;  %503 = vmatpush1.bf16.msra.mxu0 %v892_v14 }
  0x75   : > { %767 = vmatprep.subr.bf16.mxu1 %v893_v16  ;;  %504 = vmatprep.subr.bf16.mxu0 %v893_v16 }
  0x78   : > { %783 = vmatpush1.bf16.msra.mxu1 %v895_v17  ;;  %505 = vmatpush1.bf16.msra.mxu0 %v895_v17 }
  0x79   : > { %768 = vmatprep.subr.bf16.mxu1 %v896_v18  ;;  %506 = vmatprep.subr.bf16.mxu0 %v896_v18 }
  0x7c   : > { %784 = vmatpush1.bf16.msra.mxu1 %v898_v19  ;;  %507 = vmatpush1.bf16.msra.mxu0 %v898_v19 }
  0x7d   : > { %769 = vmatprep.subr.bf16.mxu1 %v899_v20  ;;  %508 = vmatprep.subr.bf16.mxu0 %v899_v20 }
  0x80   : > { %785 = vmatpush1.bf16.msra.mxu1 %v901_v21  ;;  %509 = vmatpush1.bf16.msra.mxu0 %v901_v21 }
  0x81   : > { %770 = vmatprep.subr.bf16.mxu1 %v902_v22  ;;  %510 = vmatprep.subr.bf16.mxu0 %v902_v22 }
  0x84   : > { %786 = vmatpush1.bf16.msra.mxu1 %v904_v23  ;;  %511 = vmatpush1.bf16.msra.mxu0 %v904_v23 }
  0x85   : > { %771 = vmatprep.subr.bf16.mxu1 %v905_v24  ;;  %512 = vmatprep.subr.bf16.mxu0 %v905_v24 }
  0x88   : > { %787 = vmatpush1.bf16.msra.mxu1 %v907_v25  ;;  %513 = vmatpush1.bf16.msra.mxu0 %v907_v25 }
  0x89   : > { %772 = vmatprep.subr.bf16.mxu1 %v908_v26  ;;  %514 = vmatprep.subr.bf16.mxu0 %v908_v26 }
  0x8c   : > { %788 = vmatpush1.bf16.msra.mxu1 %v910_v27  ;;  %515 = vmatpush1.bf16.msra.mxu0 %v910_v27 }
  0x8d   : > { %773 = vmatprep.subr.bf16.mxu1 %v911_v28  ;;  %516 = vmatprep.subr.bf16.mxu0 %v911_v28 }
  0x90   : > { %789 = vmatpush1.bf16.msra.mxu1 %v913_v29  ;;  %517 = vmatpush1.bf16.msra.mxu0 %v913_v29 }
  0x91   : > { %774 = vmatprep.subr.bf16.mxu1 %v914_v30  ;;  %518 = vmatprep.subr.bf16.mxu0 %v914_v30 }
  0x94   : > { %790 = vmatpush1.bf16.msra.mxu1 %v916_v31  ;;  %519 = vmatpush1.bf16.msra.mxu0 %v916_v31 }
  0x95   : > { %775 = vmatprep.subr.bf16.mxu1 %v917_v32  ;;  %520 = vmatprep.subr.bf16.mxu0 %v917_v32 }
  0x98   : > { %791 = vmatpush1.bf16.msra.mxu1 %v919_v33  ;;  %521 = vmatpush1.bf16.msra.mxu0 %v919_v33 }
  0x9b   : > { %533 = vmatmul.mubr.bf16.vlgmr.msra.gmra.mrb[0].mxu1 %v920_v34  ;;  %523 = vmatmul.mubr.bf16.vlgmr.msra.gmra.mrb[0].mxu0 %v923_v35 }
  0x9c   : > { %542 = vmatprep.mubr.bf16.mxu1 %v926_v36 }
  0xa3   : > { %543 = vmatmul.mubr.bf16.gmra.mrb[4].mxu1 %v928_v37 }
 0x16e   : > { %v534_v45 = vpop.f32.mrb[0].mxu1  ;;  %v524_v46 = vpop.f32.mrb[0].mxu0 }
 0x16f   : > { %v535_v47 = vadd.f32 %v534_v45, %v293_v43  ;;  %v536_v48 = vpop.f32.mrb[1].mxu1  ;;  %v525_v49 = vadd.f32 %v524_v46, %v293_v43  ;;  %v526_v50 = vpop.f32.mrb[1].mxu0 }
 0x170   : > { %v537_v51 = vadd.f32 %v536_v48, %v297_v44  ;;  %v538_v52 = vpop.f32.mrb[2].mxu1  ;;  %v527_v53 = vadd.f32 %v526_v50, %v297_v44  ;;  %v528_v54 = vpop.f32.mrb[2].mxu0 }
 0x171   : > { %v557_v55 = vmax.f32 %v535_v47, 0.0  ;;  %v539_v56 = vadd.f32 %v538_v52, %v293_v43  ;;  %v540_v57 = vpop.f32.mrb[3].mxu1  ;;  %v553_v58 = vmax.f32 %v525_v49, 0.0  ;;  %v529_v59 = vadd.f32 %v528_v54, %v293_v43  ;;  %v530_v60 = vpop.f32.mrb[3].mxu0 }
 0x172   : > { %v558_v61 = vmax.f32 %v537_v51, 0.0  ;;  %v541_v62 = vadd.f32 %v540_v57, %v297_v44  ;;  %v554_v63 = vmax.f32 %v527_v53, 0.0  ;;  %v531_v0 = vadd.f32 %v530_v60, %v297_v44 }
 0x173   : > { %569 = vst [vmem:[%s1278_s10 + $0x20] sm:$0xff] %v557_v55  ;;  %v559_v1 = vmax.f32 %v539_v56, 0.0  ;;  %565 = vst [vmem:[%s1278_s10] sm:$0xff] %v553_v58  ;;  %v555_v2 = vmax.f32 %v529_v59, 0.0 }
 0x174   : > { %570 = vst [vmem:[%s1278_s10 + $0x28] sm:$0xff] %v558_v61  ;;  %v560_v3 = vmax.f32 %v541_v62, 0.0  ;;  %566 = vst [vmem:[%s1278_s10 + $0x8] sm:$0xff] %v554_v63  ;;  %v556_v4 = vmax.f32 %v531_v0, 0.0 }
 0x175   : > { %571 = vst [vmem:[%s1278_s10 + $0x30] sm:$0xff] %v559_v1  ;;  %567 = vst [vmem:[%s1278_s10 + $0x10] sm:$0xff] %v555_v2 }
 0x176   : > { %572 = vst [vmem:[%s1278_s10 + $0x38] sm:$0xff] %v560_v3  ;;  %568 = vst [vmem:[%s1278_s10 + $0x18] sm:$0xff] %v556_v4  ;;  %v544_v5 = vpop.f32.mrb[4].mxu1 }
 0x177   : > { %v545_v6 = vadd.f32 %v544_v5, %v293_v43  ;;  %v546_v7 = vpop.f32.mrb[5].mxu1 }
 0x178   : > { %v547_v8 = vadd.f32 %v546_v7, %v297_v44  ;;  %v548_v9 = vpop.f32.mrb[6].mxu1 }
 0x179   : > { %v561_v10 = vmax.f32 %v545_v6, 0.0  ;;  %v549_v11 = vadd.f32 %v548_v9, %v293_v43  ;;  %v550_v12 = vpop.f32.mrb[7].mxu1 }
 0x17a   : > { %v562_v13 = vmax.f32 %v547_v8, 0.0  ;;  %v551_v14 = vadd.f32 %v550_v12, %v297_v44 }
 0x17b   : > { %573 = vst [vmem:[%s1278_s10 + $0x40] sm:$0xff] %v561_v10  ;;  %v563_v15 = vmax.f32 %v549_v11, 0.0 }
 0x17c   : > { %574 = vst [vmem:[%s1278_s10 + $0x48] sm:$0xff] %v562_v13  ;;  %v564_v16 = vmax.f32 %v551_v14, 0.0 }
 0x17d   : > { %575 = vst [vmem:[%s1278_s10 + $0x50] sm:$0xff] %v563_v15 }
 0x17e   : > { %576 = vst [vmem:[%s1278_s10 + $0x58] sm:$0xff] %v564_v16 }
 0x17f   : > { %1000 = shalt.err (!%p997_p5)
}
 0x180   : > { %s1001_s26 = scalar_lea.hbm %s1294_s19, 1536  ;;  %s1005_s20 = scalar_lea.hbm %s1351_s3, 3072 }
 0x181   : > { %p1002_p9 = scmp.ne.s32.totalorder %s1294_s19, %s1001_s26  ;;  %p1006_p3 = scmp.lt.u32.totalorder %s1294_s19, %s1351_s3 }
 0x182   : > { %p1007_p7 = scmp.lt.u32.totalorder %s1005_s20, %s1001_s26  ;;  %p1009_p4 = scmp.lt.u32.totalorder %s1001_s26, %s1294_s19 }
 0x183   : > { %p1003_p1 = pnand %p1002_p9, %p1197_p10 }
 0x184   : > { %p1008_p11 = por %p1007_p7, %p1006_p3 }
 0x185   : > { %p1004_p2 = pneg %p1003_p1 }
 0x186   : > { %p1010_p6 = por %p1009_p4, %p1008_p11 }
 0x188   : > { %p1011_p8 = pnand %p1010_p6, %p1004_p2 }
 0x18a   : > { %1014 = shalt.err (!%p1011_p8)
}
 0x18b   : > { %s1080_s10 = smov 256   ;;  %s1081_s11 = smov 16  }
 0x18c   : > { %801 = dma.vmem_to_hbm [thread:$0]  (%p1197_p10), %s1296_s7, 1536, %s1294_s19, %s578_s15, %s1080_s10, %s1080_s10, %s1081_s11  }
 0x18d PF: > { %s609_s8 = sand.u32 1, %s1053_s12   ;;  %p1368_p12 = scmp.ne.s32.totalorder %s1359_s23, 0 }
 0x18e   : > { %p1369_p13 = scmp.ge.s32.totalorder %s1073_s17, 2  ;;  %s610_s18 = scalar_lea.sflag [#allocation4], %s609_s8 }
 0x190   : > { %p812_p0 = pnand %p1369_p13, %p1368_p12 }
 0x192   : > { %1048 = dma.done.wait (!%p812_p0), %s610_s18, 1536  }
 0x193   : > { %1050 = vsyncadd (!%p812_p0), %s610_s18, 4294965760  ;;  %s20_s17 = sadd.s32 1, %s1073_s17   ;;  %s1370_s12 = smov %s1057_s13 }
 0x194   : > { %p17_p5 = scmp.ge.s32.totalorder %s20_s17, 4   ;;  %s1371_s13 = smov %s1061_s14 }
 0x195   : > { %s1372_s14 = smov %s1206_s5  ;;  %s1373_s15 = smov %s1069_s16 }
 0x196   : > { %s1374_s16 = smov %s1376_s28  ;;  %19 = sbr.rel (!%p17_p5) target bundleno = 7 (0x7), region = 85 }
 0x19d   :  { %615 = vsyncpa [#allocation3], 1 }
 0x19e   :  { %617 = vsyncpa [#allocation3 + $0x1], 1 }
 0x19f   :  { %618 = vsyncpa [#allocation6], 1 }
 0x1a0   :  { %619 = vsyncpa [#allocation4], 1 }
 0x1a1   :  { %621 = vsyncpa [#allocation4 + $0x1], 1 }

</bundles_post_ra>
